<compile_context>
chip_gen: v6e
topology: v6e:2x2x1
jax: 0.10.0
libtpu: 0.0.40
codegen_flags: <defaults>
</compile_context>

<pallas_src>
import math

import jax
import jax.numpy as jnp
from jax.experimental import pallas as pl
from jax.experimental.pallas import tpu as pltpu

_LANE = 128
_MAX_TILE_BYTES = 6 * 1024 * 1024        # per-buffer VMEM tile budget
_VMEM_LIMIT_BYTES = 40 * 1024 * 1024     # 4 x 6 MiB buffers + Mosaic scratch
_MIN_SPLIT_BYTES = 2 * 1024 * 1024       # force >= 2 tiles (v7x megacore)
_WIDE_SPLIT_BYTES = 16 * 1024 * 1024     # force >= 8 tiles on larger arrays


def _identity_kernel(x_ref, o_ref):
    # Pure pass-through: copy the VMEM tile unchanged.
    o_ref[...] = x_ref[...]


def _round_up(x, m):
    return -(-x // m) * m


def _sublane_multiple(dtype):
    # Sublane packing granule: 8 for 32-bit, 16 for bf16/f16, 32 for int8/fp8.
    return max(8, 32 // dtype.itemsize)


def _num_tiles(total_bytes):
    n = -(-total_bytes // _MAX_TILE_BYTES)
    if total_bytes >= _WIDE_SPLIT_BYTES:
        n = max(n, 8)
    elif total_bytes >= _MIN_SPLIT_BYTES:
        n = max(n, 2)
    return max(n, 1)


def _copy_call(x, block_shape, index_map, grid, donate):
    return pl.pallas_call(
        _identity_kernel,
        out_shape=jax.ShapeDtypeStruct(x.shape, x.dtype),
        grid=grid,
        in_specs=[pl.BlockSpec(block_shape, index_map)],
        out_specs=pl.BlockSpec(block_shape, index_map),
        compiler_params=pltpu.CompilerParams(
            dimension_semantics=("parallel",),
            vmem_limit_bytes=_VMEM_LIMIT_BYTES,
        ),
        input_output_aliases={0: 0} if donate else {},
    )(x)


def _copy_lane_dense(x, donate):
    """x.size % 128 == 0: flatten to a lane-dense (rows, cols) view (free
    reshape, no HBM copy) so stores are unmasked full-vreg vst."""
    total = x.size
    cols = next(c for c in (512, 256, 128) if total % c == 0)
    rows = total // cols
    x2 = x.reshape(rows, cols)
    mult = _sublane_multiple(x2.dtype)
    n = _num_tiles(total * x2.dtype.itemsize)
    if n <= 1 or rows <= mult:
        tile_r = rows                      # single full-extent block (legal)
    else:
        tile_r = min(rows, _round_up(-(-rows // n), mult))
    grid = (pl.cdiv(rows, tile_r),)
    y2 = _copy_call(x2, (tile_r, cols), lambda i: (i, 0), grid, donate)
    return y2.reshape(x.shape)


def _copy_flat_lanes(x, donate):
    """Ragged fallback: view as (1, total) and tile along the lane axis with
    128-multiple blocks; the partial last block is clipped by Pallas, so no
    jnp.pad / slice copies are needed."""
    total = x.size
    flat = x.reshape(1, total)
    itemsize = flat.dtype.itemsize
    infl = _sublane_multiple(flat.dtype)   # (1, C) blocks fill 1/infl sublanes
    budget = max(_LANE, ((_MAX_TILE_BYTES // (infl * itemsize)) // _LANE) * _LANE)
    tile_c = total if total <= budget else budget
    grid = (pl.cdiv(total, tile_c),)
    y = _copy_call(flat, (1, tile_c), lambda j: (0, j), grid, donate)
    return y.reshape(x.shape)


def _copy_native_shape(x, donate):
    """Ragged totals, ndim >= 2: copy in the original shape.  Trailing dims
    stay full-extent (always layout-legal), only the leading axis is tiled.
    HBM traffic is exactly the real bytes; only VMEM tiles carry lane/sublane
    padding."""
    shape = x.shape
    ndim = x.ndim
    itemsize = x.dtype.itemsize
    mult = _sublane_multiple(x.dtype)

    # Padded VMEM footprint of one leading-axis slice.
    lane_pad = _round_up(shape[-1], _LANE)
    if ndim == 2:
        unit_padded = lane_pad
    else:
        inner = math.prod(shape[1:-2])
        unit_padded = inner * _round_up(shape[-2], mult) * lane_pad
    unit_bytes = unit_padded * itemsize

    # If even the smallest legal leading-axis block overflows the tile budget,
    # use the flat lane-tiled fallback instead.
    min_block0 = min(shape[0], mult if ndim == 2 else 1)
    if min_block0 * unit_bytes > _MAX_TILE_BYTES:
        return _copy_flat_lanes(x, donate)

    d0 = shape[0]
    real_bytes = x.size * itemsize
    n = max(_num_tiles(real_bytes), -(-(d0 * unit_bytes) // _MAX_TILE_BYTES))
    if n <= 1 or d0 <= 1:
        tile0 = d0
    else:
        tile0 = -(-d0 // n)
        cap = _MAX_TILE_BYTES // unit_bytes
        if ndim == 2:
            tile0 = _round_up(tile0, mult)           # tile0 is the sublane dim
            cap = max(mult, (cap // mult) * mult)
        tile0 = min(tile0, cap, d0)

    grid = (pl.cdiv(d0, tile0),)
    block_shape = (tile0,) + shape[1:]
    index_map = lambda i: (i,) + (0,) * (ndim - 1)
    return _copy_call(x, block_shape, index_map, grid, donate)


def identity(x: jax.Array, *, donate: bool = False,
             passthrough: bool = False) -> jax.Array:
    """Pallas TPU identity: y = x, same shape and dtype.

    `passthrough=True` returns the input unchanged (the truly optimal
    Identity).  `donate=True` aliases the input buffer to the output
    (input_output_aliases) for callers that donate x."""
    if passthrough or x.size == 0 or x.ndim == 0:
        return x
    if x.size % _LANE == 0:
        return _copy_lane_dense(x, donate)
    if x.ndim == 1:
        return _copy_flat_lanes(x, donate)
    return _copy_native_shape(x, donate)


if __name__ == "__main__":
    key = jax.random.PRNGKey(0)

    # Small NCHW input consistent with a video/vision module's forward(x).
    x = jax.random.normal(key, (2, 4, 16, 16), dtype=jnp.float32)
    y = identity(x)
    jax.block_until_ready(y)
    assert y.shape == x.shape and y.dtype == x.dtype
    assert bool(jnp.all(y == x)), "identity kernel output mismatch"

    # Ragged (non-128-divisible) shape: native-shape path, no pad / no slice.
    x2 = jax.random.normal(jax.random.PRNGKey(1), (3, 5, 7), dtype=jnp.float32)
    y2 = identity(x2)
    jax.block_until_ready(y2)
    assert y2.shape == x2.shape and y2.dtype == x2.dtype
    assert bool(jnp.all(y2 == x2)), "identity kernel output mismatch (ragged)"

    # Sub-32-bit dtype exercises the dtype-aware sublane granule.
    x3 = jax.random.normal(jax.random.PRNGKey(2), (8, 2, 32), dtype=jnp.bfloat16)
    y3 = identity(x3)
    jax.block_until_ready(y3)
    assert y3.shape == x3.shape and y3.dtype == x3.dtype
    assert bool(jnp.all(y3 == x3)), "identity kernel output mismatch (bf16)"

    # Ragged 1-D shape exercises the flat lane-tiled fallback.
    x4 = jax.random.normal(jax.random.PRNGKey(3), (1000,), dtype=jnp.float32)
    y4 = identity(x4)
    jax.block_until_ready(y4)
    assert y4.shape == x4.shape and y4.dtype == x4.dtype
    assert bool(jnp.all(y4 == x4)), "identity kernel output mismatch (1-D ragged)"

    print("KERNEL_OK")
</pallas_src>

<mosaic_0001>
module attributes {stable_mosaic.version = 11 : i64} {
  func.func @_identity_kernel(%arg0: i32, %arg1: memref<4x512xf32, #tpu.memory_space<vmem>>, %arg2: memref<4x512xf32, #tpu.memory_space<vmem>>) attributes {dimension_semantics = [#tpu.dimension_semantics<parallel>], iteration_bounds = array<i64: 1>, scalar_prefetch = 0 : i64, scratch_operands = 0 : i64, tpu.core_type = #tpu.core_type<tc>, window_params = [{transform_indices = @transform_0, window_bounds = array<i64: 4, 512>}, {transform_indices = @transform_1, window_bounds = array<i64: 4, 512>}]} {
    %c0 = arith.constant 0 : index
    %c0_0 = arith.constant 0 : index
    %0 = vector.load %arg1[%c0, %c0_0] : memref<4x512xf32, #tpu.memory_space<vmem>>, vector<4x512xf32>
    %c0_1 = arith.constant 0 : index
    %c0_2 = arith.constant 0 : index
    %1 = vector.load %arg2[%c0_1, %c0_2] : memref<4x512xf32, #tpu.memory_space<vmem>>, vector<4x512xf32>
    tpu.vector_store %arg2[%c0_1, %c0_2], %0 {strides = array<i32>} : memref<4x512xf32, #tpu.memory_space<vmem>>, vector<4x512xf32>,
    return
  }
  func.func @transform_0(%arg0: i32) -> (i32, i32) {
    %c0_i32 = arith.constant 0 : i32
    %c0_i32_0 = arith.constant 0 : i32
    return %arg0, %c0_i32 : i32, i32
  }
  func.func @transform_1(%arg0: i32) -> (i32, i32) {
    %c0_i32 = arith.constant 0 : i32
    %c0_i32_0 = arith.constant 0 : i32
    return %arg0, %c0_i32 : i32, i32
  }
}

</mosaic_0001>

<bundles_post_ra>
// kernel: tpu_custom_call.1
= control target key start
LH: loop header
LB: loop body
LE: loop exit
PB: predicated region body
PF: predicated region fallthrough
CT: control target
= control target key end

     0   :  { %6 = vsyncpa [#allocation3], 0  ;;  %s104_s0 = inlined_call_operand.hbm [shape: f32[4,512], index: 0, kind: input, shape index: {}]   ;;  %s105_s1 = inlined_call_operand.hbm [shape: f32[4,512], index: 1, kind: output, shape index: {}]  }
   0x1   :  { %7 = vsyncpa [#allocation4], 0  ;;  %s86_s6 = smov [#allocation2]  }
   0x2   :  { %s14_s7 = sshll.u32 %s86_s6, 4  ;;  %s15_s7 = int_to_ptr.vmem [resolvable:$true] %s14_s7 }
   0x3   :  { %s50_s8 = scalar_lea.vmem %s15_s7, 256  ;;  %p55_p1 = scmp.lt.s32.totalorder %s15_s7, %s15_s7 }
   0x4   :  { %p51_p0 = scmp.ne.s32.totalorder %s15_s7, %s50_s8  ;;  %p56_p2 = scmp.lt.s32.totalorder %s50_s8, %s50_s8 }
   0x6   :  { %p57_p3 = por %p56_p2, %p55_p1 }
   0x8   :  { %p58_p4 = pnand %p57_p3, %p51_p0 }
   0xa   :  { %61 = shalt.err (!%p58_p4)
}
   0xb   :  { %17 = dma.hbm_to_vmem [thread:$0]  %s104_s0, 256, %s15_s7, [#allocation3]  }
   0xc   :  { %82 = dma.done.wait [#allocation3], 256  }
   0xd   :  { %83 = vsyncadd [#allocation3], 4294967040  ;;  %s87_s11 = smov [#allocation5]   ;;  %v21_v0 = vld [vmem:[#allocation2] sm:$0xff]  ;;  %v22_v1 = vld [vmem:[#allocation2 + $0x8] sm:$0xff] }
   0xe   :  { %s31_s12 = sshll.u32 %s87_s11, 4  ;;  %23 = vst [vmem:[#allocation5] sm:$0xff] %v21_v0  ;;  %24 = vst [vmem:[#allocation5 + $0x8] sm:$0xff] %v22_v1  ;;  %s32_s12 = int_to_ptr.vmem [resolvable:$true] %s31_s12 }
   0xf   :  { %s62_s13 = scalar_lea.vmem %s32_s12, 256  ;;  %p67_p6 = scmp.lt.s32.totalorder %s32_s12, %s32_s12 }
  0x10   :  { %p63_p5 = scmp.ne.s32.totalorder %s32_s12, %s62_s13  ;;  %p68_p7 = scmp.lt.s32.totalorder %s62_s13, %s62_s13 }
  0x12   :  { %p69_p8 = por %p68_p7, %p67_p6 }
  0x14   :  { %p70_p9 = pnand %p69_p8, %p63_p5 }
  0x16   :  { %73 = shalt.err (!%p70_p9)
}
  0x17   :  { %34 = dma.vmem_to_hbm [thread:$0]  %s32_s12, 256, %s105_s1, [#allocation4]  }
  0x18   :  { %84 = dma.done.wait [#allocation4], 256  }
  0x19   :  { %85 = vsyncadd [#allocation4], 4294967040 }
  0x1a   :  { %38 = vsyncpa [#allocation3], 1 }
  0x1b   :  { %39 = vsyncpa [#allocation4], 1 }

</bundles_post_ra>
